<compile_context>
chip_gen: v5e
topology: v5e:2x2
jax: 0.10.0
libtpu: 0.0.40
codegen_flags: <defaults>
</compile_context>

<pallas_src>
import functools
import math

import jax
import jax.numpy as jnp
from jax import lax
from jax.experimental import pallas as pl
from jax.experimental.pallas import tpu as pltpu

LAYER_NORM_EPS = 1e-12
VOCAB_OUT = 768          # decoder output dim, fixed in the module
INV_SQRT2 = 1.0 / math.sqrt(2.0)


def _round_up(x, m):
    return ((x + m - 1) // m) * m


def _gelu_erf(x):
    # exact erf-based gelu, same as the PyTorch reference
    return 0.5 * x * (1.0 + lax.erf(x * INV_SQRT2))


def mlm_head_kernel(x_ref, w1_ref, b1_ref, gamma_ref, beta_ref,
                    w2_ref, b2_ref, o_ref):
    # x_ref:      (tm, H)   bf16 activation tile
    # w1_ref:     (H, H)    bf16 dense weight (in, out layout)
    # b1_ref:     (1, H)    f32 dense bias
    # gamma/beta: (1, H)    f32 LayerNorm scale / shift
    # w2_ref:     (H, 768)  bf16 decoder weight (in, out layout)
    # b2_ref:     (1, 768)  f32 decoder bias
    # o_ref:      (tm, 768) f32 output tile

    # dense: bf16 MXU matmul, f32 accumulation
    h = jnp.dot(x_ref[...], w1_ref[...], preferred_element_type=jnp.float32)
    h = h + b1_ref[...]

    # erf gelu in f32
    h = _gelu_erf(h)

    # LayerNorm over last dim (biased variance), two-pass for numerics
    mean = jnp.mean(h, axis=-1, keepdims=True)
    centered = h - mean
    var = jnp.mean(centered * centered, axis=-1, keepdims=True)
    h = centered * lax.rsqrt(var + LAYER_NORM_EPS)
    h = h * gamma_ref[...] + beta_ref[...]

    # decoder: bf16 MXU matmul, f32 accumulation
    y = jnp.dot(h.astype(jnp.bfloat16), w2_ref[...],
                preferred_element_type=jnp.float32)
    o_ref[...] = (y + b2_ref[...]).astype(o_ref.dtype)


def _vmem_limit_bytes(tm_eff, H):
    # Size the scoped VMEM request to actual need + headroom; never request
    # all of a v7x core's 64 MiB.
    weights = (H * H + H * VOCAB_OUT) * 2                    # resident bf16 W1/W2
    small = (3 * H + VOCAB_OUT) * 4                          # biases / LN params
    x_buf = 2 * tm_eff * H * 2                               # double-buffered x
    o_buf = 2 * tm_eff * VOCAB_OUT * 4                       # double-buffered out
    interm = 4 * tm_eff * H * 4                              # f32 h / gelu / LN live
    need = weights + small + x_buf + o_buf + interm
    return int(min(max(2 * need, 16 * 1024 * 1024), 48 * 1024 * 1024))


@functools.partial(jax.jit, static_argnames=("tm",))
def visual_only_mlm_head(sequence_output, params, *, tm=256):
    """sequence_output: (B, S, H) -> (B, S, 768) float32."""
    B, S, H = sequence_output.shape
    M = B * S

    # bf16 activations: MXU-native, half the HBM->VMEM activation DMA.
    x2d = sequence_output.reshape(M, H).astype(jnp.bfloat16)

    # Row tile: big MXU-friendly tiles for large M, but never fewer than
    # 2 grid steps when M allows it (so the "parallel" axis can shard across
    # both v7x TensorCores). No padding: Pallas masks the ragged last block.
    half = (M + 1) // 2
    tm_eff = max(8, min(tm, _round_up(half, 8)))
    grid = (pl.cdiv(M, tm_eff),)

    # Weights are expected to already be bf16 (see init_params); these casts
    # fold to no-ops under jit otherwise.
    w1 = params["dense_w"].astype(jnp.bfloat16)
    w2 = params["dec_w"].astype(jnp.bfloat16)
    b1 = params["dense_b"].astype(jnp.float32)
    gamma = params["ln_gamma"].astype(jnp.float32)
    beta = params["ln_beta"].astype(jnp.float32)
    b2 = params["dec_b"].astype(jnp.float32)

    const = lambda i: (0, 0)
    single = pl.Buffered(1)   # grid-invariant operands: no double buffering

    cost = pl.CostEstimate(
        flops=2 * M * H * (H + VOCAB_OUT),
        transcendentals=M * H,                               # erf per element
        bytes_accessed=(M * H * 2                            # x (bf16)
                        + (H * H + H * VOCAB_OUT) * 2        # weights (bf16)
                        + (3 * H + VOCAB_OUT) * 4            # biases / LN
                        + M * VOCAB_OUT * 4),                # output (f32)
    )

    out = pl.pallas_call(
        mlm_head_kernel,
        out_shape=jax.ShapeDtypeStruct((M, VOCAB_OUT), jnp.float32),
        grid_spec=pl.GridSpec(
            grid=grid,
            in_specs=[
                pl.BlockSpec((tm_eff, H), lambda i: (i, 0)),                    # x tile
                pl.BlockSpec((H, H), const, pipeline_mode=single),              # dense W
                pl.BlockSpec((1, H), const, pipeline_mode=single),              # dense b
                pl.BlockSpec((1, H), const, pipeline_mode=single),              # ln gamma
                pl.BlockSpec((1, H), const, pipeline_mode=single),              # ln beta
                pl.BlockSpec((H, VOCAB_OUT), const, pipeline_mode=single),      # decoder W
                pl.BlockSpec((1, VOCAB_OUT), const, pipeline_mode=single),      # decoder b
            ],
            out_specs=pl.BlockSpec((tm_eff, VOCAB_OUT), lambda i: (i, 0)),
        ),
        compiler_params=pltpu.CompilerParams(
            dimension_semantics=("parallel",),
            vmem_limit_bytes=_vmem_limit_bytes(tm_eff, H),
        ),
        cost_estimate=cost,
    )(x2d, w1, b1, gamma, beta, w2, b2)

    return out.reshape(B, S, VOCAB_OUT)


def reference_forward(sequence_output, params):
    """Plain-JAX f32 reference for correctness checking."""
    x = sequence_output.astype(jnp.float32)
    h = x @ params["dense_w"].astype(jnp.float32) + params["dense_b"][0]
    h = _gelu_erf(h)
    mean = jnp.mean(h, axis=-1, keepdims=True)
    var = jnp.mean((h - mean) ** 2, axis=-1, keepdims=True)
    h = (h - mean) / jnp.sqrt(var + LAYER_NORM_EPS)
    h = h * params["ln_gamma"][0] + params["ln_beta"][0]
    return h @ params["dec_w"].astype(jnp.float32) + params["dec_b"][0]


def init_params(key, hidden_size):
    """Deterministic synthetic parameters (PyTorch Linear stores (out,in);
    we store (in,out) so the kernel computes x @ W directly). Matmul weights
    are pre-converted to bf16 once here so no per-call cast traffic is paid."""
    k1, k2, k3, k4 = jax.random.split(key, 4)
    scale1 = 1.0 / math.sqrt(hidden_size)
    return {
        "dense_w": jax.random.uniform(k1, (hidden_size, hidden_size),
                                      jnp.float32, -scale1, scale1
                                      ).astype(jnp.bfloat16),
        "dense_b": jax.random.uniform(k3, (1, hidden_size),
                                      jnp.float32, -scale1, scale1),
        "ln_gamma": jnp.ones((1, hidden_size), jnp.float32),
        "ln_beta": jnp.zeros((1, hidden_size), jnp.float32),
        "dec_w": jax.random.uniform(k2, (hidden_size, VOCAB_OUT),
                                    jnp.float32, -scale1, scale1
                                    ).astype(jnp.bfloat16),
        "dec_b": jax.random.uniform(k4, (1, VOCAB_OUT),
                                    jnp.float32, -scale1, scale1),
    }


if __name__ == "__main__":
    key = jax.random.PRNGKey(0)

    # Primary small-shape check (module-consistent shapes).
    batch, seq, hidden = 2, 8, 32
    kx, kp, kx2, kp2 = jax.random.split(key, 4)
    sequence_output = jax.random.normal(kx, (batch, seq, hidden), jnp.float32)
    params = init_params(kp, hidden)

    out = visual_only_mlm_head(sequence_output, params)
    out = jax.block_until_ready(out)
    ref = reference_forward(sequence_output, params)
    assert out.shape == (batch, seq, VOCAB_OUT)
    # bf16 activations/weights with f32 accumulation vs f32 reference is a
    # deliberate deviation -> looser tolerance, do not tighten without
    # reverting the casts.
    assert jnp.allclose(out, ref, atol=4e-2, rtol=4e-2), "mismatch vs JAX reference"

    # Secondary check: exercises multi-step grid + ragged last block path
    # (M=144, tm=64 -> grid=3, last block half out-of-bounds).
    b2_, s2_, h2_ = 2, 72, 128
    x2 = jax.random.normal(kx2, (b2_, s2_, h2_), jnp.float32)
    p2 = init_params(kp2, h2_)
    out2 = jax.block_until_ready(visual_only_mlm_head(x2, p2, tm=64))
    ref2 = reference_forward(x2, p2)
    assert out2.shape == (b2_, s2_, VOCAB_OUT)
    assert jnp.allclose(out2, ref2, atol=4e-2, rtol=4e-2), "mismatch (ragged tiled path)"
    assert bool(jnp.all(jnp.isfinite(out2))), "non-finite values leaked from masked rows"

    print("KERNEL_OK")
</pallas_src>

<mosaic_0001>
module attributes {stable_mosaic.version = 11 : i64} {
  func.func @mlm_head_kernel(%arg0: i32, %arg1: memref<8x32xbf16, #tpu.memory_space<vmem>>, %arg2: memref<32x32xbf16, #tpu.memory_space<vmem>>, %arg3: memref<1x32xf32, #tpu.memory_space<vmem>>, %arg4: memref<1x32xf32, #tpu.memory_space<vmem>>, %arg5: memref<1x32xf32, #tpu.memory_space<vmem>>, %arg6: memref<32x768xbf16, #tpu.memory_space<vmem>>, %arg7: memref<1x768xf32, #tpu.memory_space<vmem>>, %arg8: memref<8x768xf32, #tpu.memory_space<vmem>>) attributes {dimension_semantics = [#tpu.dimension_semantics<parallel>], iteration_bounds = array<i64: 2>, scalar_prefetch = 0 : i64, scratch_operands = 0 : i64, tpu.core_type = #tpu.core_type<tc>, window_params = [{transform_indices = @transform_0, window_bounds = array<i64: 8, 32>}, {pipeline_mode = #tpu.pipeline_mode<synchronous>, transform_indices = @transform_1, window_bounds = array<i64: 32, 32>}, {pipeline_mode = #tpu.pipeline_mode<synchronous>, transform_indices = @transform_2, window_bounds = array<i64: 1, 32>}, {pipeline_mode = #tpu.pipeline_mode<synchronous>, transform_indices = @transform_3, window_bounds = array<i64: 1, 32>}, {pipeline_mode = #tpu.pipeline_mode<synchronous>, transform_indices = @transform_4, window_bounds = array<i64: 1, 32>}, {pipeline_mode = #tpu.pipeline_mode<synchronous>, transform_indices = @transform_5, window_bounds = array<i64: 32, 768>}, {pipeline_mode = #tpu.pipeline_mode<synchronous>, transform_indices = @transform_6, window_bounds = array<i64: 1, 768>}, {transform_indices = @transform_7, window_bounds = array<i64: 8, 768>}]} {
    %c0 = arith.constant 0 : index
    %c0_0 = arith.constant 0 : index
    %0 = vector.load %arg1[%c0, %c0_0] : memref<8x32xbf16, #tpu.memory_space<vmem>>, vector<8x32xbf16>
    %c0_1 = arith.constant 0 : index
    %c0_2 = arith.constant 0 : index
    %1 = vector.load %arg2[%c0_1, %c0_2] : memref<32x32xbf16, #tpu.memory_space<vmem>>, vector<32x32xbf16>
    %cst = arith.constant dense<0.000000e+00> : vector<8x32xf32>
    %2 = tpu.matmul %0, %1, %cst {dimension_numbers = #tpu.dot_dimension_numbers<[1], [0], [0], [1], [0, 0, 1, 1], [], []>} : vector<8x32xbf16>, vector<32x32xbf16>, vector<8x32xf32> -> vector<8x32xf32>
    %c0_3 = arith.constant 0 : index
    %c0_4 = arith.constant 0 : index
    %3 = vector.load %arg3[%c0_3, %c0_4] : memref<1x32xf32, #tpu.memory_space<vmem>>, vector<1x32xf32>
    %4 = vector.broadcast %3 : vector<1x32xf32> to vector<8x32xf32>
    %5 = arith.addf %2, %4 : vector<8x32xf32>
    %cst_5 = arith.constant 5.000000e-01 : f32
    %6 = vector.broadcast %cst_5 : f32 to vector<8x32xf32>
    %7 = arith.mulf %6, %5 : vector<8x32xf32>
    %cst_6 = arith.constant 0.707106769 : f32
    %8 = vector.broadcast %cst_6 : f32 to vector<8x32xf32>
    %9 = arith.mulf %5, %8 : vector<8x32xf32>
    %10 = math.erf %9 : vector<8x32xf32>
    %cst_7 = arith.constant 1.000000e+00 : f32
    %11 = vector.broadcast %cst_7 : f32 to vector<8x32xf32>
    %12 = arith.addf %11, %10 : vector<8x32xf32>
    %13 = arith.mulf %7, %12 : vector<8x32xf32>
    %cst_8 = arith.constant dense<0.000000e+00> : vector<8xf32>
    %14 = vector.multi_reduction <add>, %13, %cst_8 [1] : vector<8x32xf32> to vector<8xf32>
    %15 = vector.shape_cast %14 : vector<8xf32> to vector<8x1xf32>
    %cst_9 = arith.constant 3.200000e+01 : f32
    %16 = vector.broadcast %cst_9 : f32 to vector<8x1xf32>
    %17 = arith.divf %15, %16 : vector<8x1xf32>
    %18 = vector.broadcast %17 : vector<8x1xf32> to vector<8x32xf32>
    %19 = arith.subf %13, %18 : vector<8x32xf32>
    %20 = arith.mulf %19, %19 : vector<8x32xf32>
    %cst_10 = arith.constant dense<0.000000e+00> : vector<8xf32>
    %21 = vector.multi_reduction <add>, %20, %cst_10 [1] : vector<8x32xf32> to vector<8xf32>
    %22 = vector.shape_cast %21 : vector<8xf32> to vector<8x1xf32>
    %cst_11 = arith.constant 3.200000e+01 : f32
    %23 = vector.broadcast %cst_11 : f32 to vector<8x1xf32>
    %24 = arith.divf %22, %23 : vector<8x1xf32>
    %cst_12 = arith.constant 9.99999996E-13 : f32
    %25 = vector.broadcast %cst_12 : f32 to vector<8x1xf32>
    %26 = arith.addf %24, %25 : vector<8x1xf32>
    %27 = math.rsqrt %26 : vector<8x1xf32>
    %28 = vector.broadcast %27 : vector<8x1xf32> to vector<8x32xf32>
    %29 = arith.mulf %19, %28 : vector<8x32xf32>
    %c0_13 = arith.constant 0 : index
    %c0_14 = arith.constant 0 : index
    %30 = vector.load %arg4[%c0_13, %c0_14] : memref<1x32xf32, #tpu.memory_space<vmem>>, vector<1x32xf32>
    %31 = vector.broadcast %30 : vector<1x32xf32> to vector<8x32xf32>
    %32 = arith.mulf %29, %31 : vector<8x32xf32>
    %c0_15 = arith.constant 0 : index
    %c0_16 = arith.constant 0 : index
    %33 = vector.load %arg5[%c0_15, %c0_16] : memref<1x32xf32, #tpu.memory_space<vmem>>, vector<1x32xf32>
    %34 = vector.broadcast %33 : vector<1x32xf32> to vector<8x32xf32>
    %35 = arith.addf %32, %34 : vector<8x32xf32>
    %36 = arith.truncf %35 : vector<8x32xf32> to vector<8x32xbf16>
    %c0_17 = arith.constant 0 : index
    %c0_18 = arith.constant 0 : index
    %37 = vector.load %arg6[%c0_17, %c0_18] : memref<32x768xbf16, #tpu.memory_space<vmem>>, vector<32x768xbf16>
    %cst_19 = arith.constant dense<0.000000e+00> : vector<8x768xf32>
    %38 = tpu.matmul %36, %37, %cst_19 {dimension_numbers = #tpu.dot_dimension_numbers<[1], [0], [0], [1], [0, 0, 1, 1], [], []>} : vector<8x32xbf16>, vector<32x768xbf16>, vector<8x768xf32> -> vector<8x768xf32>
    %c0_20 = arith.constant 0 : index
    %c0_21 = arith.constant 0 : index
    %39 = vector.load %arg7[%c0_20, %c0_21] : memref<1x768xf32, #tpu.memory_space<vmem>>, vector<1x768xf32>
    %40 = vector.broadcast %39 : vector<1x768xf32> to vector<8x768xf32>
    %41 = arith.addf %38, %40 : vector<8x768xf32>
    %c0_22 = arith.constant 0 : index
    %c0_23 = arith.constant 0 : index
    %42 = vector.load %arg8[%c0_22, %c0_23] : memref<8x768xf32, #tpu.memory_space<vmem>>, vector<8x768xf32>
    tpu.vector_store %arg8[%c0_22, %c0_23], %41 {strides = array<i32>} : memref<8x768xf32, #tpu.memory_space<vmem>>, vector<8x768xf32>,
    return
  }
  func.func @transform_0(%arg0: i32) -> (i32, i32) {
    %c0_i32 = arith.constant 0 : i32
    %c0_i32_0 = arith.constant 0 : i32
    return %arg0, %c0_i32 : i32, i32
  }
  func.func @transform_1(%arg0: i32) -> (i32, i32) {
    %c0_i32 = arith.constant 0 : i32
    %c0_i32_0 = arith.constant 0 : i32
    %c0_i32_1 = arith.constant 0 : i32
    return %c0_i32, %c0_i32_0 : i32, i32
  }
  func.func @transform_2(%arg0: i32) -> (i32, i32) {
    %c0_i32 = arith.constant 0 : i32
    %c0_i32_0 = arith.constant 0 : i32
    %c0_i32_1 = arith.constant 0 : i32
    return %c0_i32, %c0_i32_0 : i32, i32
  }
  func.func @transform_3(%arg0: i32) -> (i32, i32) {
    %c0_i32 = arith.constant 0 : i32
    %c0_i32_0 = arith.constant 0 : i32
    %c0_i32_1 = arith.constant 0 : i32
    return %c0_i32, %c0_i32_0 : i32, i32
  }
  func.func @transform_4(%arg0: i32) -> (i32, i32) {
    %c0_i32 = arith.constant 0 : i32
    %c0_i32_0 = arith.constant 0 : i32
    %c0_i32_1 = arith.constant 0 : i32
    return %c0_i32, %c0_i32_0 : i32, i32
  }
  func.func @transform_5(%arg0: i32) -> (i32, i32) {
    %c0_i32 = arith.constant 0 : i32
    %c0_i32_0 = arith.constant 0 : i32
    %c0_i32_1 = arith.constant 0 : i32
    return %c0_i32, %c0_i32_0 : i32, i32
  }
  func.func @transform_6(%arg0: i32) -> (i32, i32) {
    %c0_i32 = arith.constant 0 : i32
    %c0_i32_0 = arith.constant 0 : i32
    %c0_i32_1 = arith.constant 0 : i32
    return %c0_i32, %c0_i32_0 : i32, i32
  }
  func.func @transform_7(%arg0: i32) -> (i32, i32) {
    %c0_i32 = arith.constant 0 : i32
    %c0_i32_0 = arith.constant 0 : i32
    return %arg0, %c0_i32 : i32, i32
  }
}

</mosaic_0001>

<bundles_post_ra>
// kernel: visual_only_mlm_head.1
= control target key start
LH: loop header
LB: loop body
LE: loop exit
PB: predicated region body
PF: predicated region fallthrough
CT: control target
= control target key end

     0   :  { %12 = vsyncpa [#allocation3], 0  ;;  %s1100_s0 = inlined_call_operand.vmem [shape: bf16[16,32], index: 0, kind: input, shape index: {}]   ;;  %s1101_s1 = inlined_call_operand.vmem [shape: bf16[32,32], index: 1, kind: input, shape index: {}]   ;;  %s1102_s2 = inlined_call_operand.vmem [shape: f32[1,32], index: 2, kind: input, shape index: {}]   ;;  %s1103_s3 = inlined_call_operand.vmem [shape: f32[1,32], index: 3, kind: input, shape index: {}]   ;;  %s1104_s4 = inlined_call_operand.vmem [shape: f32[1,32], index: 4, kind: input, shape index: {}]   ;;  %s1105_s5 = inlined_call_operand.hbm [shape: bf16[32,768], index: 5, kind: input, shape index: {}]   ;;  %s1106_s6 = inlined_call_operand.vmem [shape: f32[1,768], index: 6, kind: input, shape index: {}]   ;;  %s1107_s7 = inlined_call_operand.hbm [shape: f32[16,768], index: 7, kind: output, shape index: {}]  }
   0x1   :  { %13 = vsyncpa [#allocation4], 0 }
   0x2   :  { %15 = vsyncpa [#allocation4 + $0x1], 0  ;;  %s969_s24 = smov 0   ;;  %s971_s25 = smov 0  }
   0x3   :  { %s973_s26 = smov 0   ;;  %s975_s27 = smov 0  }
   0x4 LB: > { %s990_s28 = sadd.s32 4294967295, %s923_s27   ;;  %s675_s29 = sadd.s32 4294967294, %s923_s27   ;;  %s923_s27 = sphi %s975_s27, %s1113_s27   ;;  %s919_s26 = sphi %s973_s26, %s1112_s26   ;;  %s915_s25 = sphi %s971_s25, %s1111_s25   ;;  %s911_s24 = sphi %s969_s24, %s1110_s24  }
   0x5   : > { %s994_s30 = sadd.s32 1, %s923_s27   ;;  %s180_s8 = sadd.s32 1, %s919_s26 }
   0x6   : > { %s177_s9 = ssub.s32 %s923_s27, %s994_s30  ;;  %p190_p0 = scmp.ne.s32.totalorder %s919_s26, %s915_s25 }
   0x7   : > { %p178_p1 = scmp.eq.s32.totalorder %s177_s9, 0  ;;  %p191_p2 = scmp.eq.s32.totalorder %s990_s28, 1 }
   0x8   : > { %p196_p3 = scmp.ne.s32.totalorder %s915_s25, %s911_s24  ;;  %p197_p4 = scmp.eq.s32.totalorder %s675_s29, 1 }
   0x9   : > { %s1005_s10 = scalar_select %p178_p1, %s919_s26, %s180_s8  }
   0xa   : > { %p1007_p5 = por %p191_p2, %p190_p0  ;;  %p1011_p6 = por %p197_p4, %p196_p3 }
   0xb   : > { %p676_p7 = scmp.ge.s32.totalorder %s923_s27, 1  ;;  %p204_p8 = scmp.lt.s32.totalorder %s923_s27, 3 }
   0xc   : > { %p779_p9 = scmp.eq.s32.totalorder %s990_s28, 0  ;;  %s227_s15 = sshll.u32 %s1105_s5, 4  ;;  %s228_s15 = int_to_ptr.hbm [resolvable:$true] %s227_s15 }
   0xd   : > { %p205_p10 = pnand %p676_p7, %p204_p8  ;;  %s925_s16 = smov [#allocation2]  }
   0xe   : > { %s229_s17 = sshll.u32 %s925_s16, 4  ;;  %s926_s18 = smov 384   ;;  %s230_s17 = int_to_ptr.vmem [resolvable:$true] %s229_s17 }
   0xf   : > { %p771_p11 = pneg %p205_p10  ;;  %s927_s19 = smov 24  }
  0x10   : > { %255 = sbr.rel (%p205_p10) target bundleno = 635 (0x27b), region = 48 }
  0x11   : > { %p772_p12 = pnand %p779_p9, %p771_p11 }
  0x13   : > { %774 = dma.hbm_to_vmem [thread:$0]  (!%p772_p12), %s228_s15, 1536, %s230_s17, [#allocation3], %s926_s18, %s926_s18, %s927_s19  }
  0x15   : > { %902 = dma.done.wait (%p779_p9), [#allocation3], 1536  }
  0x16   : > { %904 = vsyncadd (%p779_p9), [#allocation3], 4294965760  ;;  %p287_p13 = scmp.lt.s32.totalorder %s990_s28, 1  ;;  %v750_v0 = vld [vmem:[%s1101_s1 + $0x8] sm:$0xff]  ;;  %v749_v1 = vld [vmem:[%s1101_s1] sm:$0xff]  ;;  %vm313_vm0 = vcmask 261120  }
  0x17   : > { %323 = vmatpush.bf16.msra.mxu0 %v750_v0  ;;  %v818_v3 = vld [vmem:[%s1102_s2] ss:$0 sm:$0xff]  ;;  %v928_v47 = vmov 32.0   ;;  %v760_v60 = vld [vmem:[#allocation2 + $0x44] sm:$0xf0]  ;;  %s284_s21 = sand.u32 1, %s915_s25  }
  0x18   : > { %s288_s20 = scalar_select %p287_p13, %s990_s28, 1  ;;  %v718_v59 = vld [vmem:[#allocation2 + $0x30] sm:$0xf]  ;;  %v757_v61 = vld [vmem:[#allocation2 + $0x34] sm:$0xf] }
  0x19   : > { %v719_v62 = vor.u32 %v760_v60, %v718_v59  ;;  %v720_v63 = vld [vmem:[#allocation2 + $0x48] sm:$0xf0]  ;;  %v726_v0 = vld [vmem:[#allocation2 + $0x38] sm:$0xf]  ;;  %s763_s29 = smul.u32 48, %s284_s21 }
  0x1a   : > { %s681_s23 = sshll.u32 %s288_s20, 2  ;;  %s764_s9 = smul.u32 48, %s990_s28 }
  0x1b   : > { %s290_s14 = scalar_lea.vmem %s1100_s0, %s681_s23  ;;  %324 = vmatpush.bf16.msra.mxu0 %v749_v1  ;;  %v761_v1 = vld [vmem:[#allocation2 + $0x4c] sm:$0xf0]  ;;  %509 = vmatpush.bf16.msra.mxu1 %v719_v62  ;;  %s286_s8 = scalar_lea.vmem [#allocation5], %s763_s29 }
  0x1c   : > { %v292_v2 = vld [vmem:[%s290_s14] sm:$0xf]  ;;  %s599_s15 = scalar_lea.hbm %s1107_s7, %s764_s9  ;;  %s601_s16 = sshll.u32 %s286_s8, 4  ;;  %s602_s16 = int_to_ptr.vmem [resolvable:$true] %s601_s16 }
  0x1d   : > { %s603_s17 = sshll.u32 %s599_s15, 4  ;;  %s588_s28 = scalar_lea.sflag [#allocation4], %s284_s21  ;;  %s604_s17 = int_to_ptr.hbm [resolvable:$true] %s603_s17 }
  0x1e   : > { %690 = vmatmul.msk.bf16.vlgmr.msra.gmra.mxu0 %vm313_vm0, %v292_v2  ;;  %v723_v2 = vor.u32 %v757_v61, %v720_v63  ;;  %s871_s18 = sshra.s32 %s604_s17, 4  ;;  %s877_s23 = scalar_lea.hbm %s1107_s7, 96  ;;  %s872_s18 = int_to_ptr.hbm [resolvable:$true] %s871_s18 }
  0x1f   : > { %s873_s19 = scalar_lea.hbm %s872_s18, 48  ;;  %p878_p3 = scmp.lt.s32.totalorder %s872_s18, %s1107_s7 }
  0x20   : > { %522 = vmatpush.bf16.msra.mxu2 %v723_v2  ;;  %p874_p0 = scmp.ne.s32.totalorder %s872_s18, %s873_s19  ;;  %p879_p4 = scmp.lt.s32.totalorder %s877_s23, %s873_s19 }
  0x22   : > { %p875_p1 = pnand %p874_p0, %p1007_p5  ;;  %p880_p7 = por %p879_p4, %p878_p3 }
  0x24   : > { %p876_p2 = pneg %p875_p1 }
  0x26   : > { %p881_p8 = pnand %p880_p7, %p876_p2 }
  0x9b   : > { %v326_v4 = vpop.f32.mrf.mxu0 }
  0x9c   : > { %v327_v5 = vadd.f32 %v818_v3, %v326_v4  ;;  %v727_v3 = vor.u32 %v761_v1, %v726_v0  ;;  %v758_v4 = vld [vmem:[#allocation2 + $0x3c] sm:$0xf] }
  0x9e   : > { %v331_v6 = vmul.f32 0.70710677, %v327_v5  ;;  %v330_v43 = vmul.f32 0.5, %v327_v5  ;;  %v728_v5 = vld [vmem:[#allocation2 + $0x50] sm:$0xf0]  ;;  %535 = vmatpush.bf16.msra.mxu3 %v727_v3 }
  0xa0   : > { %v332_v7 = vmul.f32 %v331_v6, %v331_v6 }
  0xa2   : > { %v333_v8 = vmin.f32 %v332_v7, 16.0  ;;  %v694_v7 = vld [vmem:[#allocation2] sm:$0xf] }
  0xa3   : > { %v328_v9 = vpop.f32.mrf.mxu0 }
  0xa4   : > { %v334_v10 = vmul.f32 2.1237322e-06, %v333_v8  ;;  %v345_v11 = vmul.f32 3.8918573e-05, %v333_v8  ;;  %v751_v9 = vld [vmem:[#allocation2 + $0x4] sm:$0xf] }
  0xa6   : > { %v335_v12 = vadd.f32 0.00028619796, %v334_v10  ;;  %v346_v13 = vadd.f32 0.001143296, %v345_v11  ;;  %v696_v11 = vld [vmem:[#allocation2 + $0x18] sm:$0xf0] }
  0xa8   : > { %v336_v14 = vmul.f32 %v335_v12, %v333_v8  ;;  %v347_v15 = vmul.f32 %v346_v13, %v333_v8  ;;  %v702_v12 = vld [vmem:[#allocation2 + $0x8] sm:$0xf]  ;;  %v755_v13 = vld [vmem:[#allocation2 + $0x1c] sm:$0xf0] }
  0xaa   : > { %v348_v16 = vadd.f32 0.014752088, %v347_v15  ;;  %v337_v17 = vadd.f32 0.0036580483, %v336_v14  ;;  %v699_v14 = vor.u32 %v751_v9, %v696_v11  ;;  %v703_v15 = vor.u32 %v755_v13, %v702_v12 }
  0xac   : > { %v349_v18 = vmul.f32 %v348_v16, %v333_v8  ;;  %v338_v20 = vmul.f32 %v337_v17, %v333_v8  ;;  %v752_v16 = vld [vmem:[#allocation2 + $0xc] sm:$0xf]  ;;  %v704_v17 = vld [vmem:[#allocation2 + $0x20] sm:$0xf0]  ;;  %523 = vmatpush.bf16.msra.mxu2 %v699_v14  ;;  %536 = vmatpush.bf16.msra.mxu3 %v703_v15 }
  0xae   : > { %v350_v19 = vadd.f32 0.112945676, %v349_v18  ;;  %v339_v23 = vadd.f32 0.05243302, %v338_v20  ;;  %v707_v18 = vor.u32 %v752_v16, %v704_v17  ;;  %v759_v20 = vld [vmem:[#allocation2 + $0x44] sm:$0xf] }
  0xb0   : > { %v351_v21 = vmul.f32 %v350_v19, %v333_v8  ;;  %v340_v26 = vmul.f32 %v339_v23, %v333_v8 }
  0xb2   : > { %v352_v22 = vadd.f32 0.4994258, %v351_v21  ;;  %v341_v27 = vadd.f32 0.18741608, %v340_v26  ;;  %v736_v21 = vld [vmem:[#allocation2 + $0x58] sm:$0xf0] }
  0xb3   : > { %v753_v26 = vld [vmem:[#allocation2 + $0x14] sm:$0xf] }
  0xb4   : > { %v353_v24 = vmul.f32 %v352_v22, %v333_v8  ;;  %v342_v29 = vmul.f32 %v341_v27, %v333_v8  ;;  %v754_v8 = vld [vmem:[#allocation2 + $0x14] sm:$0xf0]  ;;  %v734_v22 = vld [vmem:[#allocation2 + $0x40] sm:$0xf]  ;;  %v712_v27 = vld [vmem:[#allocation2 + $0x28] sm:$0xf0] }
  0xb5   : > { %v695_v10 = vor.u32 %v754_v8, %v694_v7 }
  0xb6   : > { %v354_v25 = vadd.f32 1.0, %v353_v24  ;;  %v343_v33 = vadd.f32 1.1283791, %v342_v29  ;;  %v739_v24 = vor.u32 %v759_v20, %v736_v21  ;;  %v710_v29 = vld [vmem:[#allocation2 + $0x10] sm:$0xf] }
  0xb7   : > { %510 = vmatpush.bf16.msra.mxu1 %v695_v10 }
  0xb8   : > { %821 = vrcp.f32 %v354_v25  ;;  %v366_v32 = vand.u32 2147483648, %v354_v25  ;;  %v364_v35 = vand.u32 2147483647, %v354_v25  ;;  %vm360_vm2 = vweird.f32 %v354_v25  ;;  %574 = vmatpush.bf16.msrb.mxu2 %v739_v24 }
  0xb9   : > { %v344_v38 = vmul.f32 %v343_v33, %v331_v6  ;;  %823 = vrcp.f32 %v928_v47  ;;  %v731_v6 = vor.u32 %v758_v4, %v728_v5  ;;  %v426_v47 = vld [vmem:[%s1106_s6] sm:$0x3f] }
  0xba   : > { %v367_v37 = vor.u32 1.1754944e-38, %v366_v32  ;;  %vm365_vm4 = vcmp.eq.f32.partialorder %v364_v35, 8.507059e+37  ;;  %v715_v32 = vor.u32 %v753_v26, %v712_v27  ;;  %v432_v62 = vperm.slane %v426_v47, 4 }
  0xbb   : > { %548 = vmatpush.bf16.msrb.mxu0 %v731_v6  ;;  %v433_v3 = vperm.slane %v426_v47, 5 }
  0xbc   : > { %575 = vmatpush.bf16.msrb.mxu2 %v715_v32 }
  0xbe   : > { %v822_v28 = vpop.eup %821 }
  0xbf   : > { %v356_v30 = vmul.f32 %v822_v28, %v354_v25  ;;  %vm361_vm1 = vweird.f32 %v822_v28  ;;  %v824_v48 = vpop.eup %823  ;;  %549 = vmatpush.bf16.msrb.mxu0 %v707_v18  ;;  %v762_v25 = vld [vmem:[#allocation2 + $0x54] sm:$0xf0] }
  0xc0   : > { %vm362_vm3 = vmor %vm360_vm2, %vm361_vm1  ;;  %v378_v49 = vmul.f32 32.0, %v824_v48  ;;  %vm382_vm5 = vweird.f32 %v824_v48 }
  0xc1   : > { %v357_v31 = vsub.f32 1.0, %v356_v30  ;;  %v756_v30 = vld [vmem:[#allocation2 + $0x24] sm:$0xf0] }
  0xc2   : > { %v379_v50 = vsub.f32 1.0, %v378_v49  ;;  %v711_v33 = vor.u32 %v756_v30, %v710_v29  ;;  %v431_v49 = vperm.slane %v426_v47, 3 }
  0xc3   : > { %v358_v34 = vmul.f32 %v822_v28, %v357_v31 }
  0xc4   : > { %v380_v51 = vmul.f32 %v824_v48, %v379_v50 }
  0xc5   : > { %v359_v36 = vadd.f32 %v822_v28, %v358_v34 }
  0xc6   : > { %v381_v52 = vadd.f32 %v824_v48, %v380_v51 }
  0xc7   : > { %v363_v39 = vsel %vm362_vm3, %v822_v28, %v359_v36  ;;  %v735_v28 = vor.u32 %v762_v25, %v734_v22 }
  0xc8   : > { %v368_v40 = vsel %vm365_vm4, %v367_v37, %v363_v39  ;;  %v383_v53 = vsel %vm382_vm5, %v824_v48, %v381_v52  ;;  %v428_v48 = vperm.slane %v426_v47, 0 }
  0xc9   : > { %v369_v41 = vmul.f32 %v368_v40, %v344_v38  ;;  %561 = vmatpush.bf16.msrb.mxu1 %v735_v28  ;;  %v819_v40 = vld [vmem:[%s1103_s3] ss:$0 sm:$0xff] }
  0xcb   : > { %v691_v42 = vclamps-f32 %v369_v41, 1.0 }
  0xcd   : > { %v372_v44 = vadd.f32 1.0, %v691_v42  ;;  %562 = vmatpush.bf16.msrb.mxu1 %v711_v33  ;;  %v820_v42 = vld [vmem:[%s1104_s4] ss:$0 sm:$0xff] }
  0xcf   : > { %v373_v45 = vmul.f32 %v372_v44, %v330_v43 }
  0xd1   : > { %v374_v46 = vsel %vm313_vm0, %v373_v45, 0.0 }
  0xd2   : > { %375 = vadd.xlane.f32.xlu0 %v374_v46 }
 0x145   : > { %v376_v54 = vpop.xlane.xlu0 %375 }
 0x146   : > { %v384_v55 = vmul.f32 %v383_v53, %v376_v54  ;;  %v429_v54 = vperm.slane %v426_v47, 1 }
 0x148   : > { %v1043_v56 = vsub.f32 %v373_v45, %v384_v55  ;;  %v430_v55 = vperm.slane %v426_v47, 2 }
 0x14a   : > { %v386_v57 = vmul.f32 %v1043_v56, %v1043_v56 }
 0x14c   : > { %v387_v58 = vsel %vm313_vm0, %v386_v57, 0.0 }
 0x14d   : > { %388 = vadd.xlane.f32.xlu0 %v387_v58 }
 0x1c0   : > { %v389_v19 = vpop.xlane.xlu0 %388 }
 0x1c1   : > { %v390_v23 = vmul.f32 %v389_v19, %v383_v53 }
 0x1c3   : > { %v391_v31 = vadd.f32 1e-12, %v390_v23 }
 0x1c5   : > { %825 = vrsqrt.f32 %v391_v31  ;;  %vm398_vm7 = vweird.f32 %v391_v31 }
 0x1cb   : > { %v826_v34 = vpop.eup %825 }
 0x1cc   : > { %v393_v35 = vmul.f32 %v826_v34, %v391_v31  ;;  %vm399_vm6 = vweird.f32 %v826_v34 }
 0x1cd   : > { %vm400_vm8 = vmor %vm398_vm7, %vm399_vm6 }
 0x1ce   : > { %v394_v36 = vmul.f32 %v826_v34, %v393_v35 }
 0x1d0   : > { %v395_v37 = vmul.f32 0.5, %v394_v36 }
 0x1d2   : > { %v396_v38 = vsub.f32 1.5, %v395_v37 }
 0x1d4   : > { %v397_v39 = vmul.f32 %v826_v34, %v396_v38 }
 0x1d6   : > { %v401_v41 = vsel %vm400_vm8, %v826_v34, %v397_v39 }
 0x1d7   : > { %v402_v43 = vmul.f32 %v401_v41, %v1043_v56 }
 0x1d9   : > { %v407_v44 = vmul.f32 %v819_v40, %v402_v43 }
 0x1db   : > { %v412_v45 = vadd.f32 %v820_v42, %v407_v44 }
 0x1dd   : > { %v413_v46 = vpack.c.bf16 %v412_v45, %v412_v45 }
 0x1df   : > { %740 = vmatmul.msk.bf16.vlgmr.msra.gmra.mxu1 %vm313_vm0, %v413_v46  ;;  %741 = vmatmul.msk.bf16.vlgmr.msra.gmra.mxu2 %vm313_vm0, %v413_v46 }
 0x1e0   : > { %742 = vmatmul.msk.bf16.vlgmr.msra.gmra.mxu3 %vm313_vm0, %v413_v46  ;;  %743 = vmatmul.msk.bf16.vlgmr.msrb.gmra.mxu0 %vm313_vm0, %v413_v46 }
 0x1ef   : > { %744 = vmatmul.msk.bf16.vlgmr.msrb.gmra.mxu1 %vm313_vm0, %v413_v46  ;;  %745 = vmatmul.msk.bf16.vlgmr.msrb.gmra.mxu2 %vm313_vm0, %v413_v46 }
 0x25c   : > { %v512_v50 = vpop.f32.mrf.mxu1 }
 0x25d   : > { %v513_v51 = vadd.f32 %v512_v50, %v428_v48  ;;  %v551_v52 = vpop.f32.mrf.mxu0 }
 0x25e   : > { %v552_v53 = vadd.f32 %v551_v52, %v431_v49 }
 0x25f   : > { %581 = vst [vmem:[%s286_s8] sm:$0xff] %v513_v51 }
 0x260   : > { %584 = vst [vmem:[%s286_s8 + $0x18] sm:$0xff] %v552_v53 }
 0x262   : > { %v525_v56 = vpop.f32.mrf.mxu2 }
 0x263   : > { %v526_v57 = vadd.f32 %v525_v56, %v429_v54  ;;  %v538_v58 = vpop.f32.mrf.mxu3 }
 0x264   : > { %v539_v59 = vadd.f32 %v538_v58, %v430_v55  ;;  %v514_v60 = vpop.f32.mrf.mxu1 }
 0x265   : > { %582 = vst [vmem:[%s286_s8 + $0x8] sm:$0xff] %v526_v57  ;;  %v553_v61 = vpop.f32.mrf.mxu0 }
 0x266   : > { %583 = vst [vmem:[%s286_s8 + $0x10] sm:$0xff] %v539_v59 }
 0x26a   : > { %v527_v63 = vpop.f32.mrf.mxu2 }
 0x26b   : > { %v540_v0 = vpop.f32.mrf.mxu3 }
 0x26c   : > { %v564_v1 = vpop.f32.mrf.mxu1 }
 0x26d   : > { %v565_v2 = vadd.f32 %v564_v1, %v432_v62 }
 0x26f   : > { %585 = vst [vmem:[%s286_s8 + $0x20] sm:$0xff] %v565_v2 }
 0x272   : > { %v577_v4 = vpop.f32.mrf.mxu2 }
 0x273   : > { %v578_v5 = vadd.f32 %v577_v4, %v433_v3 }
 0x274   : > { %v566_v6 = vpop.f32.mrf.mxu1 }
 0x275   : > { %586 = vst [vmem:[%s286_s8 + $0x28] sm:$0xff] %v578_v5 }
 0x276   : > { %884 = shalt.err (!%p881_p8)
}
 0x277   : > { %769 = dma.vmem_to_hbm [thread:$0]  (%p1007_p5), %s602_s16, 768, %s604_s17, %s588_s28  }
 0x27a   : > { %v579_v7 = vpop.f32.mrf.mxu2 }
 0x27b PF: > { %p781_p9 = scmp.ge.s32.totalorder %s923_s27, 2  ;;  %s615_s21 = sand.u32 1, %s911_s24  }
 0x27c   : > { %s616_s8 = scalar_lea.sflag [#allocation4], %s615_s21 }
 0x27d   : > { %p776_p10 = pnand %p781_p9, %p1011_p6 }
 0x27f   : > { %p777_p11 = pneg %p776_p10 }
 0x281   : > { %906 = dma.done.wait (%p777_p11), %s616_s8, 768  }
 0x282   : > { %908 = vsyncadd (%p777_p11), %s616_s8, 4294966528  ;;  %p18_p12 = scmp.ge.s32.totalorder %s994_s30, 4   ;;  %s1110_s24 = smov %s915_s25 }
 0x283   : > { %s1111_s25 = smov %s919_s26  ;;  %s1112_s26 = smov %s1005_s10 }
 0x284   : > { %s1113_s27 = smov %s994_s30  ;;  %20 = sbr.rel (!%p18_p12) target bundleno = 4 (0x4), region = 88 }
 0x289   :  { %622 = vsyncpa [#allocation3], 1 }
 0x28a   :  { %624 = vsyncpa [#allocation3 + $0x1], 1 }
 0x28b   :  { %625 = vsyncpa [#allocation4], 1 }
 0x28c   :  { %627 = vsyncpa [#allocation4 + $0x1], 1 }

</bundles_post_ra>
